<compile_context>
chip_gen: v7x
topology: tpu7x:2x2x1
jax: 0.10.0
libtpu: 0.0.40
codegen_flags: <defaults>
</compile_context>

<pallas_src>
import jax
import jax.numpy as jnp
from jax.experimental import pallas as pl
from jax.experimental.pallas import tpu as pltpu


def _round_down(x, unit):
    return max(unit, (x // unit) * unit)


def _derive_budget():
    """Per-generation (block_byte_target, scoped_vmem_limit_bytes)."""
    block_bytes, vmem_limit = 2 << 20, None            # safe everywhere
    try:
        vmem = int(pltpu.get_tpu_info().vmem_capacity_bytes)
    except Exception:
        return block_bytes, vmem_limit
    if vmem >= (96 << 20):
        # 128 MiB-VMEM chips (v5e / v6e): 4 MiB blocks.  Explicit 32 MiB
        # scoped budget so the double-buffered in+out pipeline (4 x 4 MiB)
        # also fits on v5e, whose default scoped limit is only 16 MiB.
        return 4 << 20, 32 << 20
    # 64 MiB per-TC VMEM (v7x): ~3.2 TB/s HBM wants bigger blocks to amortize
    # the ~0.35 us per-grid-step overhead; 48 MiB scoped leaves headroom.
    return 8 << 20, 48 << 20


def _fold_factor(N, C):
    """2-D path: fold k rows into lanes so the lane width k*C reaches >=128.

    Returns the smallest divisor k of N with k*C >= 128 (lane-dense stores);
    falls back to the largest divisor within a 1024-lane cap.  If N has no
    useful divisor the input runs at C/128 lane utilization (documented)."""
    if C >= 128:
        return 1
    best = 1
    limit = max(1, 1024 // max(C, 1))
    for cand in range(1, min(N, limit) + 1):
        if N % cand == 0:
            best = cand
            if cand * C >= 128:
                break
    return best


def _select_tiles_4d(R, HW, itemsize, block_bytes, row_unit):
    """Joint tile selection: full-width lanes first, then grow rows."""
    min_rows = R if R < row_unit else row_unit
    if HW * itemsize * min_rows <= block_bytes:
        tile_hw = HW                                   # contiguous DMA
    else:
        tile_hw = min(HW, _round_down(block_bytes // (min_rows * itemsize), 128))
    max_rows = max(min_rows, block_bytes // max(1, tile_hw * itemsize))
    tile_r = R if R <= max_rows else _round_down(max_rows, row_unit)
    return tile_r, tile_hw


def _ensure_two_steps(tile_r, tile_hw, R, HW, row_unit):
    """v7x has 2 TensorCores; a 1-step grid would leave one idle."""
    if pl.cdiv(R, tile_r) * pl.cdiv(HW, tile_hw) > 1:
        return tile_r, tile_hw
    if tile_r >= 2 * row_unit:                         # prefer keeping lanes full-width
        return _round_down((tile_r + 1) // 2, row_unit), tile_hw
    if tile_hw >= 256:
        return tile_r, _round_down((tile_hw + 1) // 2, 128)
    return tile_r, tile_hw


def _actnorm_kernel_rows(x_ref, p_ref, o_ref):
    # p_ref: (tile_r, 2) float32 with [:, 0] = scale, [:, 1] = bias (= scale*loc).
    # Affine computed in f32 regardless of input dtype; cast only on the store.
    x = x_ref[...].astype(jnp.float32)
    o_ref[...] = (x * p_ref[:, 0:1] + p_ref[:, 1:2]).astype(o_ref.dtype)


def _actnorm_kernel_cols(x_ref, p_ref, o_ref):
    # p_ref: (2, Cf) float32 with row 0 = scale, row 1 = bias; sublane-broadcast.
    x = x_ref[...].astype(jnp.float32)
    o_ref[...] = (x * p_ref[0:1, :] + p_ref[1:2, :]).astype(o_ref.dtype)


def actnorm_forward(x, loc, scale, *, logdet=False):
    """ActNorm forward (already-initialized / eval mode).

    x:     (N, C, H, W) or (N, C)
    loc:   (1, C, 1, 1)
    scale: (1, C, 1, 1)
    """
    dtype = x.dtype
    itemsize = jnp.dtype(dtype).itemsize
    row_unit = 8 * max(1, 4 // itemsize)        # 8 f32 / 16 bf16 / 32 int8-fp8
    block_bytes, vmem_limit = _derive_budget()

    scale_vec = scale.reshape(-1).astype(jnp.float32)
    loc_vec = loc.reshape(-1).astype(jnp.float32)
    bias_vec = scale_vec * loc_vec              # scale*(x+loc) == x*scale + bias
    C = scale_vec.shape[0]

    if x.ndim == 2:
        # ---- 2-D path: C (optionally row-folded) on the lane axis. ----
        N, Cx = x.shape
        assert Cx == C
        H = W = 1

        k = _fold_factor(N, C)
        Nf, Cf = N // k, k * C
        x2 = x.reshape(Nf, Cf)
        params = jnp.stack([jnp.tile(scale_vec, (k,)),
                            jnp.tile(bias_vec, (k,))], axis=0)      # (2, Cf) f32

        max_rows = max(row_unit, block_bytes // max(1, Cf * itemsize))
        tile_n = Nf if Nf <= max_rows else _round_down(max_rows, row_unit)
        if pl.cdiv(Nf, tile_n) == 1 and tile_n >= 2 * row_unit:
            tile_n = _round_down((tile_n + 1) // 2, row_unit)       # 2 TCs on v7x
        grid = (pl.cdiv(Nf, tile_n),)

        h2 = pl.pallas_call(
            _actnorm_kernel_cols,
            out_shape=jax.ShapeDtypeStruct((Nf, Cf), dtype),
            grid_spec=pltpu.PrefetchScalarGridSpec(
                num_scalar_prefetch=0,
                grid=grid,
                in_specs=[
                    pl.BlockSpec((tile_n, Cf), lambda i: (i, 0)),
                    pl.BlockSpec((2, Cf), lambda i: (0, 0)),
                ],
                out_specs=pl.BlockSpec((tile_n, Cf), lambda i: (i, 0)),
            ),
            compiler_params=pltpu.CompilerParams(
                dimension_semantics=("parallel",),
                vmem_limit_bytes=vmem_limit),
            cost_estimate=pl.CostEstimate(
                flops=2 * N * C, transcendentals=0,
                bytes_accessed=2 * N * C * itemsize + int(params.size) * 4),
        )(x2, params)
        h = h2.reshape(N, C)
    else:
        # ---- 4-D path: fold N into sublanes; spatial axis on lanes. ----
        N, Cx, H, W = x.shape
        assert Cx == C
        HW = H * W
        R = N * C
        x2 = x.reshape(R, HW)
        # Per-row packed [scale, bias]; row r = n*C + c -> channel c.
        params = jnp.tile(jnp.stack([scale_vec, bias_vec], axis=-1), (N, 1))  # (R,2) f32

        tile_r, tile_hw = _select_tiles_4d(R, HW, itemsize, block_bytes, row_unit)
        tile_r, tile_hw = _ensure_two_steps(tile_r, tile_hw, R, HW, row_unit)
        grid = (pl.cdiv(R, tile_r), pl.cdiv(HW, tile_hw))

        out2 = pl.pallas_call(
            _actnorm_kernel_rows,
            out_shape=jax.ShapeDtypeStruct((R, HW), dtype),
            grid_spec=pltpu.PrefetchScalarGridSpec(
                num_scalar_prefetch=0,
                grid=grid,
                in_specs=[
                    pl.BlockSpec((tile_r, tile_hw), lambda r, s: (r, s)),
                    pl.BlockSpec((tile_r, 2), lambda r, s: (r, 0)),
                ],
                out_specs=pl.BlockSpec((tile_r, tile_hw), lambda r, s: (r, s)),
            ),
            compiler_params=pltpu.CompilerParams(
                dimension_semantics=("parallel", "parallel"),
                vmem_limit_bytes=vmem_limit),
            cost_estimate=pl.CostEstimate(
                flops=2 * R * HW, transcendentals=0,
                bytes_accessed=2 * R * HW * itemsize + int(params.size) * 4),
        )(x2, params)
        h = out2.reshape(N, C, H, W)

    if logdet:
        # Tiny C-length reduction; plain JAX glue, computed/returned in float32.
        ld_val = jnp.float32(H * W) * jnp.sum(jnp.log(jnp.abs(scale_vec)))
        ld = jnp.full((x.shape[0],), ld_val, dtype=jnp.float32)
        return h, ld
    return h


# TODO(synk): training-time lazy initialization (data-dependent loc/scale from
# batch statistics + the `initialized` buffer) and the reverse() path are
# stateful module behaviour outside the forward-pass spec and are not ported.


if __name__ == "__main__":
    key = jax.random.PRNGKey(0)
    N, C, H, W = 2, 4, 16, 16

    kx, kl, ks = jax.random.split(key, 3)
    x = jax.random.normal(kx, (N, C, H, W), dtype=jnp.float32)

    # Deterministic "trained" parameters (non-trivial so the affine is exercised).
    loc = jax.random.normal(kl, (1, C, 1, 1), dtype=jnp.float32) * 0.1
    scale = 1.0 + 0.5 * jax.random.uniform(ks, (1, C, 1, 1), dtype=jnp.float32)

    # 4-D path with logdet.
    h, ld = actnorm_forward(x, loc, scale, logdet=True)
    h = jax.block_until_ready(h)
    ld = jax.block_until_ready(ld)

    h_ref = scale * (x + loc)
    ld_ref = (H * W) * jnp.sum(jnp.log(jnp.abs(scale))) * jnp.ones((N,), jnp.float32)
    assert h.shape == (N, C, H, W)
    assert ld.dtype == jnp.float32
    assert jnp.allclose(h, h_ref, atol=1e-5, rtol=1e-5)
    assert jnp.allclose(ld, ld_ref, atol=1e-5, rtol=1e-5)

    # 2-D path (squeeze branch): small N, C on lanes.
    x2d = jax.random.normal(kx, (N, C), dtype=jnp.float32)
    h2d = jax.block_until_ready(actnorm_forward(x2d, loc, scale, logdet=False))
    h2d_ref = scale.reshape(1, C) * (x2d + loc.reshape(1, C))
    assert h2d.shape == (N, C)
    assert jnp.allclose(h2d, h2d_ref, atol=1e-5, rtol=1e-5)

    # 2-D path with a larger N exercises the lane-folding (k*C >= 128) branch.
    xbig = jax.random.normal(kx, (64, C), dtype=jnp.float32)
    hbig = jax.block_until_ready(actnorm_forward(xbig, loc, scale, logdet=False))
    hbig_ref = scale.reshape(1, C) * (xbig + loc.reshape(1, C))
    assert hbig.shape == (64, C)
    assert jnp.allclose(hbig, hbig_ref, atol=1e-5, rtol=1e-5)

    # bf16 input: params stay f32, affine computed in f32 in-kernel, bf16 store.
    xb = x.astype(jnp.bfloat16)
    hb = jax.block_until_ready(actnorm_forward(xb, loc, scale, logdet=False))
    hb_ref = (scale * (xb.astype(jnp.float32) + loc)).astype(jnp.bfloat16)
    assert hb.dtype == jnp.bfloat16
    assert jnp.allclose(hb.astype(jnp.float32), hb_ref.astype(jnp.float32),
                        atol=2e-2, rtol=2e-2)

    print("KERNEL_OK")
</pallas_src>

<mosaic_0001>
module attributes {stable_mosaic.version = 11 : i64} {
  func.func @_actnorm_kernel_rows(%arg0: i32, %arg1: i32, %arg2: memref<8x128xf32, #tpu.memory_space<vmem>>, %arg3: memref<8x2xf32, #tpu.memory_space<vmem>>, %arg4: memref<8x128xf32, #tpu.memory_space<vmem>>) attributes {dimension_semantics = [#tpu.dimension_semantics<parallel>, #tpu.dimension_semantics<parallel>], iteration_bounds = array<i64: 1, 2>, scalar_prefetch = 0 : i64, scratch_operands = 0 : i64, tpu.core_type = #tpu.core_type<tc>, window_params = [{transform_indices = @transform_0, window_bounds = array<i64: 8, 128>}, {transform_indices = @transform_1, window_bounds = array<i64: 8, 2>}, {transform_indices = @transform_2, window_bounds = array<i64: 8, 128>}]} {
    %c0 = arith.constant 0 : index
    %c0_0 = arith.constant 0 : index
    %0 = vector.load %arg2[%c0, %c0_0] : memref<8x128xf32, #tpu.memory_space<vmem>>, vector<8x128xf32>
    %c0_1 = arith.constant 0 : index
    %c0_2 = arith.constant 0 : index
    %1 = vector.load %arg3[%c0_1, %c0_2] : memref<8x2xf32, #tpu.memory_space<vmem>>, vector<8x1xf32>
    %2 = vector.broadcast %1 : vector<8x1xf32> to vector<8x128xf32>
    %3 = arith.mulf %0, %2 : vector<8x128xf32>
    %c0_3 = arith.constant 0 : index
    %c1 = arith.constant 1 : index
    %4 = vector.load %arg3[%c0_3, %c1] : memref<8x2xf32, #tpu.memory_space<vmem>>, vector<8x1xf32>
    %5 = vector.broadcast %4 : vector<8x1xf32> to vector<8x128xf32>
    %6 = arith.addf %3, %5 : vector<8x128xf32>
    %c0_4 = arith.constant 0 : index
    %c0_5 = arith.constant 0 : index
    %7 = vector.load %arg4[%c0_4, %c0_5] : memref<8x128xf32, #tpu.memory_space<vmem>>, vector<8x128xf32>
    tpu.vector_store %arg4[%c0_4, %c0_5], %6 {strides = array<i32>} : memref<8x128xf32, #tpu.memory_space<vmem>>, vector<8x128xf32>,
    return
  }
  func.func @transform_0(%arg0: i32, %arg1: i32) -> (i32, i32) {
    %c0_i32 = arith.constant 0 : i32
    return %arg0, %arg1 : i32, i32
  }
  func.func @transform_1(%arg0: i32, %arg1: i32) -> (i32, i32) {
    %c0_i32 = arith.constant 0 : i32
    %c0_i32_0 = arith.constant 0 : i32
    return %arg0, %c0_i32 : i32, i32
  }
  func.func @transform_2(%arg0: i32, %arg1: i32) -> (i32, i32) {
    %c0_i32 = arith.constant 0 : i32
    return %arg0, %arg1 : i32, i32
  }
}

</mosaic_0001>

<bundles_post_ra>
// kernel: tpu_custom_call.1
= control target key start
LH: loop header
LB: loop body
LE: loop exit
PB: predicated region body
PF: predicated region fallthrough
CT: control target
= control target key end

     0   :  { %7 = vsyncpa [#allocation3], 0  ;;  %s709_s0 = inlined_call_operand.hbm [shape: f32[8,256], index: 0, kind: input, shape index: {}]   ;;  %s710_s1 = inlined_call_operand.vmem [shape: f32[8,2], index: 1, kind: input, shape index: {}]   ;;  %s711_s2 = inlined_call_operand.hbm [shape: f32[8,256], index: 2, kind: output, shape index: {}]  }
   0x1   :  { %9 = vsyncpa [#allocation3 + $0x1], 0 }
   0x2   :  { %10 = vsyncpa [#allocation4], 0 }
   0x3   :  { %12 = vsyncpa [#allocation4 + $0x1], 0  ;;  %s534_s9 = smov 0   ;;  %s536_s10 = smov 0  }
   0x4   :  { %s538_s11 = smov 0   ;;  %s540_s12 = smov 0  }
   0x5   :  { %s542_s13 = smov 0   ;;  %s544_s14 = smov 0  }
   0x6 LB: > { %s321_s15 = sadd.s32 4294967295, %s513_s14   ;;  %s322_s16 = sadd.s32 4294967294, %s513_s14   ;;  %s513_s14 = sphi %s544_s14, %s18_s14   ;;  %s509_s13 = sphi %s542_s13, %s727_s13   ;;  %s505_s12 = sphi %s540_s12, %s726_s12   ;;  %s501_s11 = sphi %s538_s11, %s725_s11   ;;  %s497_s10 = sphi %s536_s10, %s724_s10   ;;  %s493_s9 = sphi %s534_s9, %s723_s9  }
   0x7   : > { %s27_s17 = sadd.s32 1, %s509_s13  ;;  %s39_s18 = sadd.s32 1, %s501_s11 }
   0x8   : > { %p28_p0 = scmp.ge.s32.totalorder %s27_s17, 2  ;;  %p46_p1 = scmp.ne.s32.totalorder %s501_s11, %s497_s10 }
   0x9   : > { %p47_p2 = scmp.eq.s32.totalorder %s513_s14, 0  ;;  %p52_p3 = scmp.ne.s32.totalorder %s497_s10, %s493_s9 }
   0xa   : > { %s729_s17 = smov (%p28_p0, %s27_s17), 0  ;;  %p53_p5 = scmp.eq.s32.totalorder %s321_s15, 0 }
   0xb   : > { %p575_p4 = por %p47_p2, %p46_p1  ;;  %s35_s20 = ssub.s32 %s509_s13, %s729_s17 }
   0xc   : > { %p104_p6 = scmp.eq.s32.totalorder %s321_s15, 1  ;;  %p37_p7 = scmp.eq.s32.totalorder %s35_s20, 0 }
   0xd   : > { %p581_p8 = por %p53_p5, %p52_p3  ;;  %p110_p10 = scmp.eq.s32.totalorder %s322_s16, 1 }
   0xe   : > { %p585_p9 = por %p104_p6, %p46_p1  ;;  %p347_p13 = scmp.lt.s32.totalorder %s513_s14, 2 }
   0xf   : > { %s590_s23 = scalar_select %p37_p7, %s501_s11, %s39_s18  }
  0x10   : > { %s715_s22 = scalar_select %p585_p9, 1, 0 }
  0x11   : > { %p592_p11 = por %p110_p10, %p52_p3  ;;  %s137_s25 = sand.u32 1, %s501_s11  }
  0x12   : > { %s326_s26 = sshll.u32 %s137_s25, 3  ;;  %s327_s27 = sshll.u32 %s509_s13, 7 }
  0x13   : > { %s716_s24 = scalar_select %p592_p11, 1, 0 }
  0x14   : > { %s603_s30 = scalar_lea.hbm %s709_s0, %s327_s27  ;;  %s141_s3 = scalar_lea.vmem [#allocation2], %s326_s26 }
  0x15   : > { %s150_s4 = sshll.u32 %s141_s3, 4  ;;  %p609_p0 = pnand %p347_p13, %p575_p4  ;;  %s605_s4 = int_to_ptr.vmem [resolvable:$true] %s150_s4 }
  0x16   : > { %s138_s6 = scalar_lea.sflag [#allocation3], %s137_s25  ;;  %s401_s7 = scalar_lea.hbm %s603_s30, 128 }
  0x17   : > { %p402_p3 = scmp.ne.s32.totalorder %s603_s30, %s401_s7  ;;  %p403_p5 = pneg %p609_p0 }
  0x18   : > { %s406_s16 = scalar_lea.hbm %s709_s0, 256  ;;  %p407_p4 = scmp.lt.u32.totalorder %s603_s30, %s709_s0 }
  0x19   : > { %p404_p6 = pnand %p403_p5, %p402_p3  ;;  %p408_p10 = scmp.lt.u32.totalorder %s406_s16, %s401_s7 }
  0x1a   : > { %p410_p12 = scmp.lt.u32.totalorder %s401_s7, %s603_s30 }
  0x1b   : > { %p405_p7 = pneg %p404_p6  ;;  %p409_p13 = por %p408_p10, %p407_p4 }
  0x1d   : > { %p411_p1 = por %p410_p12, %p409_p13 }
  0x1f   : > { %p412_p2 = pnand %p411_p1, %p405_p7 }
  0x21   : > { %415 = shalt.err (!%p412_p2)
}
  0x22   : > { %s416_s20 = scalar_lea.vmem %s605_s4, 128  ;;  %s515_s25 = smov [#allocation2]  }
  0x23   : > { %p417_p3 = scmp.ne.s32.totalorder %s605_s4, %s416_s20  ;;  %s421_s26 = sshll.u32 %s515_s25, 4  ;;  %s422_s26 = int_to_ptr.vmem [resolvable:$false] %s421_s26 }
  0x24   : > { %s423_s27 = scalar_lea.vmem %s422_s26, 256  ;;  %p424_p9 = scmp.lt.s32.totalorder %s605_s4, %s422_s26 }
  0x25   : > { %p419_p6 = pnand %p417_p3, %p403_p5  ;;  %p425_p4 = scmp.lt.s32.totalorder %s423_s27, %s416_s20 }
  0x27   : > { %p420_p11 = pneg %p419_p6  ;;  %p426_p10 = por %p425_p4, %p424_p9 }
  0x29   : > { %p427_p12 = pnand %p426_p10, %p420_p11 }
  0x2b   : > { %430 = shalt.err (!%p427_p12)
}
  0x2c   : > { %342 = dma.hbm_to_vmem [thread:$0]  (!%p609_p0), %s603_s30, 128, %s605_s4, %s138_s6  }
  0x2d   : > { %p718_p1 = scmp.lt.s32.totalorder %s513_s14, 3  ;;  %p719_p2 = scmp.ge.s32.totalorder %s513_s14, 1 }
  0x2f   : > { %p156_p5 = pnand %p719_p2, %p718_p1 }
  0x30   : > { %s645_s28 = sand.u32 (!%p156_p5), 1, %s497_s10  }
  0x31   : > { %159 = sbr.rel (%p156_p5) target bundleno = 208 (0xd0), region = 28  ;;  %s329_s29 = sshll.u32 (!%p156_p5), %s645_s28, 3 }
  0x32   : > { %s162_s3 = scalar_lea.sflag (!%p156_p5), [#allocation3], %s645_s28  ;;  %s165_s7 = scalar_lea.vmem (!%p156_p5), [#allocation2], %s329_s29 }
  0x38   : > { %484 = dma.done.wait (%p581_p8), %s162_s3, 128  }
  0x39   : > { %486 = vsyncadd (%p581_p8), %s162_s3, 4294967168  ;;  %v516_v0 = vmov 0   ;;  %v195_v1 = vld [vmem:[%s710_s1] sm:$0xff]  ;;  %v517_v2 = vmov 1   ;;  %s332_s5 = sshll.u32 %s505_s12, 7  ;;  %s189_s6 = scalar_lea.vmem [#allocation5], %s329_s29 }
  0x3a   : > { %399 = vset.pattern.permute.xlu0 %v516_v0  ;;  %v194_v4 = vld [vmem:[%s165_s7] sm:$0xff]  ;;  %s224_s8 = sshll.u32 %s189_s6, 4  ;;  %s660_s16 = scalar_lea.hbm %s711_s2, %s332_s5  ;;  %s662_s8 = int_to_ptr.vmem [resolvable:$true] %s224_s8 }
  0x3b   : > { %198 = vperm.xlu0 %399, %v195_v1   ;;  %s209_s18 = scalar_lea.sflag [#allocation4], %s645_s28  ;;  %s431_s19 = scalar_lea.vmem %s662_s8, 128 }
  0x3c   : > { %p432_p8 = scmp.ne.s32.totalorder %s662_s8, %s431_s19  ;;  %p720_p9 = scmp.ne.s32.totalorder %s715_s22, 0 }
  0x3d   : > { %s518_s12 = smov [#allocation5]  }
  0x3e   : > { %p433_p11 = pnand %p432_p8, %p720_p9  ;;  %s435_s20 = sshll.u32 %s518_s12, 4  ;;  %s436_s20 = int_to_ptr.vmem [resolvable:$false] %s435_s20 }
  0x3f   : > { %400 = vset.pattern.permute.xlu0 %v517_v2  ;;  %s437_s25 = scalar_lea.vmem %s436_s20, 256  ;;  %p438_p7 = scmp.lt.s32.totalorder %s662_s8, %s436_s20 }
  0x40   : > { %203 = vperm.xlu0 %400, %v195_v1   ;;  %p434_p0 = pneg %p433_p11  ;;  %p439_p13 = scmp.lt.s32.totalorder %s437_s25, %s431_s19 }
  0x42   : > { %p440_p3 = por %p439_p13, %p438_p7 }
  0x44   : > { %p441_p6 = pnand %p440_p3, %p434_p0 }
  0xba   : > { %v199_v3 = vpop.permute.xlu0 %198 }
  0xbb   : > { %v201_v5 = vmul.f32 %v199_v3, %v194_v4 }
  0xbf   : > { %v204_v6 = vpop.permute.xlu0 %203 }
  0xc0   : > { %v206_v7 = vadd.f32 %v204_v6, %v201_v5 }
  0xc2   : > { %207 = vst [vmem:[%s189_s6] sm:$0xff] %v206_v7 }
  0xc3   : > { %444 = shalt.err (!%p441_p6)
}
  0xc4   : > { %s445_s26 = scalar_lea.hbm %s660_s16, 128  ;;  %s449_s29 = scalar_lea.hbm %s711_s2, 256 }
  0xc5   : > { %p446_p4 = scmp.ne.s32.totalorder %s660_s16, %s445_s26  ;;  %p450_p1 = scmp.lt.u32.totalorder %s660_s16, %s711_s2 }
  0xc6   : > { %p451_p2 = scmp.lt.u32.totalorder %s449_s29, %s445_s26  ;;  %p453_p8 = scmp.lt.u32.totalorder %s445_s26, %s660_s16 }
  0xc7   : > { %p447_p10 = pnand %p446_p4, %p720_p9 }
  0xc8   : > { %p452_p5 = por %p451_p2, %p450_p1 }
  0xc9   : > { %p448_p12 = pneg %p447_p10 }
  0xca   : > { %p454_p11 = por %p453_p8, %p452_p5 }
  0xcc   : > { %p455_p0 = pnand %p454_p11, %p448_p12 }
  0xce   : > { %458 = shalt.err (!%p455_p0)
}
  0xcf   : > { %337 = dma.vmem_to_hbm [thread:$0]  (%p720_p9), %s662_s8, 128, %s660_s16, %s209_s18  }
  0xd0 PF: > { %s236_s30 = sand.u32 1, %s493_s9   ;;  %p721_p7 = scmp.ne.s32.totalorder %s716_s24, 0 }
  0xd1   : > { %p722_p13 = scmp.ge.s32.totalorder %s513_s14, 2  ;;  %s237_s4 = scalar_lea.sflag [#allocation4], %s236_s30 }
  0xd3   : > { %p344_p3 = pnand %p722_p13, %p721_p7 }
  0xd5   : > { %488 = dma.done.wait (!%p344_p3), %s237_s4, 128  }
  0xd6   : > { %490 = vsyncadd (!%p344_p3), %s237_s4, 4294967168  ;;  %s18_s14 = sadd.s32 1, %s513_s14   ;;  %s723_s9 = smov %s497_s10 }
  0xd7   : > { %p15_p6 = scmp.ge.s32.totalorder %s18_s14, 4   ;;  %s724_s10 = smov %s501_s11 }
  0xd8   : > { %s725_s11 = smov %s590_s23  ;;  %s726_s12 = smov %s509_s13 }
  0xd9   : > { %s727_s13 = smov %s729_s17  ;;  %17 = sbr.rel (!%p15_p6) target bundleno = 6 (0x6), region = 76 }
  0xe0   :  { %242 = vsyncpa [#allocation3], 1 }
  0xe1   :  { %244 = vsyncpa [#allocation3 + $0x1], 1 }
  0xe2   :  { %245 = vsyncpa [#allocation4], 1 }
  0xe3   :  { %247 = vsyncpa [#allocation4 + $0x1], 1 }

</bundles_post_ra>
